<compile_context>
chip_gen: v7x
topology: tpu7x:2x2x1
jax: 0.10.0
libtpu: 0.0.40
codegen_flags: <defaults>
</compile_context>

<pallas_src>
import functools

import jax
import jax.numpy as jnp
from jax.experimental import pallas as pl
from jax.experimental.pallas import tpu as pltpu

LANE = 128            # lane width (last dim of every vreg)
MAX_BLOCK_ROWS = 4096 # sublane rows per grid block (upper bound)
CHUNK_ROWS = 64       # rows per in-register chunk (8 vregs per f32 array)


def _dice_kernel(pred_ref, target_ref,
                 o_sum_p, o_sum_pt, o_sum_th, o_sum_tht, o_sum_t, o_min, o_max,
                 *, rows_total, block_rows, chunk_rows, n_chunks, need_mask,
                 unroll):
    """Emits per-block partial statistics for the dice loss.

    Outputs (each a (1, 8, 128) f32 block of the (num_blocks, 8, 128) arrays):
      o_sum_p   : sum(pred_raw)              o_sum_pt  : sum(pred_raw * target)
      o_sum_th  : sum(tanh(0.5*pred))        o_sum_tht : sum(tanh(0.5*pred)*target)
      o_sum_t   : sum(target)                o_min/max : elementwise min/max of pred
    """
    i = pl.program_id(0)

    zeros = jnp.zeros((8, LANE), jnp.float32)
    init = (zeros, zeros, zeros, zeros, zeros,
            jnp.full((8, LANE), jnp.inf, jnp.float32),
            jnp.full((8, LANE), -jnp.inf, jnp.float32))

    if need_mask:
        # Valid rows remaining in this block (only the last block is ragged;
        # the comparison is harmlessly always-true for full blocks).
        rem_rows = rows_total - i * block_rows
        row_iota = jax.lax.broadcasted_iota(jnp.int32, (chunk_rows, LANE), 0)

    def vr(x, op):
        # (chunk_rows, 128) -> (chunk_rows//8, 8, 128); reduce the leading
        # (vreg-stack) axis with pure VPU ops -- no XLU inside the kernel.
        return op(x.reshape(chunk_rows // 8, 8, LANE), axis=0)

    def body(c, carry):
        sp, spt, sth, stht, st, mn, mx = carry
        r0 = pl.multiple_of(c * chunk_rows, chunk_rows)
        p = pred_ref[pl.ds(r0, chunk_rows), :].astype(jnp.float32)
        t = target_ref[pl.ds(r0, chunk_rows), :].astype(jnp.float32)
        if need_mask:
            valid = row_iota < (rem_rows - c * chunk_rows)
            p = jnp.where(valid, p, 0.0)   # masked rows contribute exactly 0
            t = jnp.where(valid, t, 0.0)
        th = jnp.tanh(0.5 * p)             # one EUP op per element
        return (sp + vr(p, jnp.sum),
                spt + vr(p * t, jnp.sum),
                sth + vr(th, jnp.sum),
                stht + vr(th * t, jnp.sum),
                st + vr(t, jnp.sum),
                jnp.minimum(mn, vr(p, jnp.min)),
                jnp.maximum(mx, vr(p, jnp.max)))

    sp, spt, sth, stht, st, mn, mx = jax.lax.fori_loop(
        0, n_chunks, body, init, unroll=unroll)

    o_sum_p[...] = sp.reshape(1, 8, LANE)
    o_sum_pt[...] = spt.reshape(1, 8, LANE)
    o_sum_th[...] = sth.reshape(1, 8, LANE)
    o_sum_tht[...] = stht.reshape(1, 8, LANE)
    o_sum_t[...] = st.reshape(1, 8, LANE)
    o_min[...] = mn.reshape(1, 8, LANE)
    o_max[...] = mx.reshape(1, 8, LANE)


def _round_up(x, m):
    return (x + m - 1) // m * m


def dice_loss(pred, target, smooth=1e-6):
    """Pallas implementation of DiceLoss.forward. Returns a scalar f32."""
    assert pred.shape == target.shape
    n = pred.size
    assert n > 0

    pred_f = pred.reshape(-1)
    target_f = target.reshape(-1)

    # Only pad when n is not a multiple of the lane width (needed for the 2-D
    # reshape).  Block alignment is handled by in-kernel masking, so the old
    # full-array pad to a block multiple (an extra HBM pass) is gone.
    # TODO(synk): the n % 128 != 0 case still costs one full-array copy via
    # jnp.pad; a 1-D-block formulation could avoid it.
    lane_pad = (-n) % LANE
    if lane_pad:
        pred_f = jnp.pad(pred_f, (0, lane_pad))
        target_f = jnp.pad(target_f, (0, lane_pad))
    rows = (n + lane_pad) // LANE

    block_rows = min(MAX_BLOCK_ROWS, _round_up(rows, CHUNK_ROWS))
    num_blocks = pl.cdiv(rows, block_rows)
    need_mask = (num_blocks * block_rows != rows)
    chunk_rows = min(CHUNK_ROWS, block_rows)
    n_chunks = block_rows // chunk_rows
    unroll = n_chunks if n_chunks <= 8 else 4

    pred_2d = pred_f.reshape(rows, LANE)
    target_2d = target_f.reshape(rows, LANE)

    in_spec = pl.BlockSpec((block_rows, LANE), lambda i: (i, 0))
    stat_shape = jax.ShapeDtypeStruct((num_blocks, 8, LANE), jnp.float32)
    stat_spec = pl.BlockSpec((1, 8, LANE), lambda i: (i, 0, 0))

    kernel = functools.partial(
        _dice_kernel, rows_total=rows, block_rows=block_rows,
        chunk_rows=chunk_rows, n_chunks=n_chunks, need_mask=need_mask,
        unroll=unroll)

    outs = pl.pallas_call(
        kernel,
        out_shape=(stat_shape,) * 7,
        grid_spec=pltpu.PrefetchScalarGridSpec(
            num_scalar_prefetch=0,
            grid=(num_blocks,),
            in_specs=[in_spec, in_spec],
            out_specs=[stat_spec] * 7,
        ),
        compiler_params=pltpu.CompilerParams(
            # Blocks are independent -> shard across both TensorCores on v7x.
            dimension_semantics=("parallel",),
            vmem_limit_bytes=32 * 1024 * 1024,
        ),
    )(pred_2d, target_2d)

    sum_p_b, sum_pt_b, sum_th_b, sum_tht_b, sum_t_b, min_b, max_b = outs

    # Tiny combine in plain JAX (also improves f32 summation accuracy: each
    # block's partials are summed independently before the final reduce).
    sum_p = jnp.sum(sum_p_b)
    sum_pt = jnp.sum(sum_pt_b)
    sum_th = jnp.sum(sum_th_b)
    sum_tht = jnp.sum(sum_tht_b)
    sum_t = jnp.sum(sum_t_b)
    p_min = jnp.min(min_b)
    p_max = jnp.max(max_b)

    # Padded / masked zeros can never falsely trigger (or suppress) this test.
    use_sigmoid = jnp.logical_or(p_min < 0.0, p_max > 1.0)
    # sigmoid(x) = 0.5*tanh(0.5*x) + 0.5; the affine is folded in here
    # (tanh(0) = 0 so padding needs no extra correction).
    sum_s = 0.5 * sum_th + 0.5 * float(n)
    sum_st = 0.5 * sum_tht + 0.5 * sum_t

    sum_pred = jnp.where(use_sigmoid, sum_s, sum_p)
    intersection = jnp.where(use_sigmoid, sum_st, sum_pt)
    union = sum_pred + sum_t
    dice = (2.0 * intersection + smooth) / (union + smooth)
    return (1.0 - dice).astype(jnp.float32)


def _dice_loss_ref(pred, target, smooth=1e-6):
    pred = pred.astype(jnp.float32)
    target = target.astype(jnp.float32)
    pred = jnp.where(
        jnp.logical_or(pred.min() < 0, pred.max() > 1),
        jax.nn.sigmoid(pred), pred)
    pf = pred.reshape(-1)
    tf = target.reshape(-1)
    inter = jnp.sum(pf * tf)
    union = jnp.sum(pf) + jnp.sum(tf)
    return 1.0 - (2.0 * inter + smooth) / (union + smooth)


if __name__ == "__main__":
    key = jax.random.PRNGKey(0)
    k1, k2 = jax.random.split(key)

    # pred: raw logits (outside [0,1]) -> sigmoid branch exercised.
    pred = jax.random.normal(k1, (2, 4, 16, 16), dtype=jnp.float32) * 3.0
    # target: binary mask.
    target = (jax.random.uniform(k2, (2, 4, 16, 16)) > 0.5).astype(jnp.float32)

    loss = jax.block_until_ready(dice_loss(pred, target))
    ref = _dice_loss_ref(pred, target)
    assert jnp.allclose(loss, ref, atol=1e-5, rtol=1e-5), (loss, ref)

    # Also check the no-sigmoid branch (pred already in [0,1]).
    pred01 = jax.nn.sigmoid(pred)
    loss01 = jax.block_until_ready(dice_loss(pred01, target))
    ref01 = _dice_loss_ref(pred01, target)
    assert jnp.allclose(loss01, ref01, atol=1e-5, rtol=1e-5), (loss01, ref01)

    # Exercise a size that is not a multiple of 128 (lane-pad + mask path).
    k3, k4 = jax.random.split(k1)
    pred_odd = jax.random.normal(k3, (3, 5, 7, 11), dtype=jnp.float32) * 2.0
    target_odd = (jax.random.uniform(k4, (3, 5, 7, 11)) > 0.5).astype(jnp.float32)
    loss_odd = jax.block_until_ready(dice_loss(pred_odd, target_odd))
    ref_odd = _dice_loss_ref(pred_odd, target_odd)
    assert jnp.allclose(loss_odd, ref_odd, atol=1e-5, rtol=1e-5), (loss_odd, ref_odd)

    # Exercise a multi-block, non-block-aligned size (ragged last block masked
    # in-kernel, no host-side pad since n % 128 == 0).
    k5, k6 = jax.random.split(k2)
    pred_big = jax.random.normal(k5, (9, 3, 160, 128), dtype=jnp.float32) * 2.0
    target_big = (jax.random.uniform(k6, (9, 3, 160, 128)) > 0.5).astype(jnp.float32)
    loss_big = jax.block_until_ready(dice_loss(pred_big, target_big))
    ref_big = _dice_loss_ref(pred_big, target_big)
    assert jnp.allclose(loss_big, ref_big, atol=1e-5, rtol=1e-5), (loss_big, ref_big)

    print("KERNEL_OK")
</pallas_src>

<mosaic_0001>
module attributes {stable_mosaic.version = 11 : i64} {
  func.func @_dice_kernel(%arg0: i32, %arg1: memref<64x128xf32, #tpu.memory_space<vmem>>, %arg2: memref<64x128xf32, #tpu.memory_space<vmem>>, %arg3: memref<1x8x128xf32, #tpu.memory_space<vmem>>, %arg4: memref<1x8x128xf32, #tpu.memory_space<vmem>>, %arg5: memref<1x8x128xf32, #tpu.memory_space<vmem>>, %arg6: memref<1x8x128xf32, #tpu.memory_space<vmem>>, %arg7: memref<1x8x128xf32, #tpu.memory_space<vmem>>, %arg8: memref<1x8x128xf32, #tpu.memory_space<vmem>>, %arg9: memref<1x8x128xf32, #tpu.memory_space<vmem>>) attributes {dimension_semantics = [#tpu.dimension_semantics<parallel>], iteration_bounds = array<i64: 1>, scalar_prefetch = 0 : i64, scratch_operands = 0 : i64, tpu.core_type = #tpu.core_type<tc>, window_params = [{transform_indices = @transform_0, window_bounds = array<i64: 64, 128>}, {transform_indices = @transform_1, window_bounds = array<i64: 64, 128>}, {transform_indices = @transform_2, window_bounds = array<i64: 1, 8, 128>}, {transform_indices = @transform_3, window_bounds = array<i64: 1, 8, 128>}, {transform_indices = @transform_4, window_bounds = array<i64: 1, 8, 128>}, {transform_indices = @transform_5, window_bounds = array<i64: 1, 8, 128>}, {transform_indices = @transform_6, window_bounds = array<i64: 1, 8, 128>}, {transform_indices = @transform_7, window_bounds = array<i64: 1, 8, 128>}, {transform_indices = @transform_8, window_bounds = array<i64: 1, 8, 128>}]} {
    %cst = arith.constant 0.000000e+00 : f32
    %0 = vector.broadcast %cst : f32 to vector<8x128xf32>
    %cst_0 = arith.constant 0x7F800000 : f32
    %1 = vector.broadcast %cst_0 : f32 to vector<8x128xf32>
    %cst_1 = arith.constant 0xFF800000 : f32
    %2 = vector.broadcast %cst_1 : f32 to vector<8x128xf32>
    %c64_i32 = arith.constant 64 : i32
    %3 = arith.muli %arg0, %c64_i32 : i32
    %c16_i32 = arith.constant 16 : i32
    %4 = arith.subi %c16_i32, %3 : i32
    %5 = tpu.iota {dimensions = array<i32: 0>} : vector<64x128xi32>
    %c0_i32 = arith.constant 0 : i32
    %c64_i32_2 = arith.constant 64 : i32
    %6 = arith.muli %c0_i32, %c64_i32_2 : i32
    %7 = tpu.assume_multiple %6, 64 : i32
    %8 = arith.index_cast %7 : i32 to index
    %c0 = arith.constant 0 : index
    %9 = vector.load %arg1[%8, %c0] : memref<64x128xf32, #tpu.memory_space<vmem>>, vector<64x128xf32>
    %10 = arith.index_cast %7 : i32 to index
    %c0_3 = arith.constant 0 : index
    %11 = vector.load %arg2[%10, %c0_3] : memref<64x128xf32, #tpu.memory_space<vmem>>, vector<64x128xf32>
    %c64_i32_4 = arith.constant 64 : i32
    %12 = arith.muli %c0_i32, %c64_i32_4 : i32
    %13 = arith.subi %4, %12 : i32
    %14 = vector.broadcast %13 : i32 to vector<64x128xi32>
    %15 = arith.cmpi slt, %5, %14 : vector<64x128xi32>
    %cst_5 = arith.constant 0.000000e+00 : f32
    %16 = vector.broadcast %cst_5 : f32 to vector<64x128xf32>
    %17 = arith.select %15, %9, %16 : vector<64x128xi1>, vector<64x128xf32>
    %cst_6 = arith.constant 0.000000e+00 : f32
    %18 = vector.broadcast %cst_6 : f32 to vector<64x128xf32>
    %19 = arith.select %15, %11, %18 : vector<64x128xi1>, vector<64x128xf32>
    %cst_7 = arith.constant 5.000000e-01 : f32
    %20 = vector.broadcast %cst_7 : f32 to vector<64x128xf32>
    %21 = arith.mulf %20, %17 : vector<64x128xf32>
    %22 = math.tanh %21 : vector<64x128xf32>
    %23 = vector.shape_cast %17 : vector<64x128xf32> to vector<8x8x128xf32>
    %cst_8 = arith.constant dense<0.000000e+00> : vector<8x128xf32>
    %24 = vector.multi_reduction <add>, %23, %cst_8 [0] : vector<8x8x128xf32> to vector<8x128xf32>
    %25 = arith.addf %0, %24 : vector<8x128xf32>
    %26 = arith.mulf %17, %19 : vector<64x128xf32>
    %27 = vector.shape_cast %26 : vector<64x128xf32> to vector<8x8x128xf32>
    %cst_9 = arith.constant dense<0.000000e+00> : vector<8x128xf32>
    %28 = vector.multi_reduction <add>, %27, %cst_9 [0] : vector<8x8x128xf32> to vector<8x128xf32>
    %29 = arith.addf %0, %28 : vector<8x128xf32>
    %30 = vector.shape_cast %22 : vector<64x128xf32> to vector<8x8x128xf32>
    %cst_10 = arith.constant dense<0.000000e+00> : vector<8x128xf32>
    %31 = vector.multi_reduction <add>, %30, %cst_10 [0] : vector<8x8x128xf32> to vector<8x128xf32>
    %32 = arith.addf %0, %31 : vector<8x128xf32>
    %33 = arith.mulf %22, %19 : vector<64x128xf32>
    %34 = vector.shape_cast %33 : vector<64x128xf32> to vector<8x8x128xf32>
    %cst_11 = arith.constant dense<0.000000e+00> : vector<8x128xf32>
    %35 = vector.multi_reduction <add>, %34, %cst_11 [0] : vector<8x8x128xf32> to vector<8x128xf32>
    %36 = arith.addf %0, %35 : vector<8x128xf32>
    %37 = vector.shape_cast %19 : vector<64x128xf32> to vector<8x8x128xf32>
    %cst_12 = arith.constant dense<0.000000e+00> : vector<8x128xf32>
    %38 = vector.multi_reduction <add>, %37, %cst_12 [0] : vector<8x8x128xf32> to vector<8x128xf32>
    %39 = arith.addf %0, %38 : vector<8x128xf32>
    %40 = vector.shape_cast %17 : vector<64x128xf32> to vector<8x8x128xf32>
    %cst_13 = arith.constant dense<0x7F800000> : vector<8x128xf32>
    %41 = vector.multi_reduction <minimumf>, %40, %cst_13 [0] : vector<8x8x128xf32> to vector<8x128xf32>
    %42 = arith.minimumf %1, %41 : vector<8x128xf32>
    %43 = vector.shape_cast %17 : vector<64x128xf32> to vector<8x8x128xf32>
    %cst_14 = arith.constant dense<0xFF800000> : vector<8x128xf32>
    %44 = vector.multi_reduction <maximumf>, %43, %cst_14 [0] : vector<8x8x128xf32> to vector<8x128xf32>
    %45 = arith.maximumf %2, %44 : vector<8x128xf32>
    %c1_i32 = arith.constant 1 : i32
    %46 = vector.shape_cast %25 : vector<8x128xf32> to vector<1x8x128xf32>
    %c0_15 = arith.constant 0 : index
    %c0_16 = arith.constant 0 : index
    %c0_17 = arith.constant 0 : index
    %47 = vector.load %arg3[%c0_15, %c0_16, %c0_17] : memref<1x8x128xf32, #tpu.memory_space<vmem>>, vector<1x8x128xf32>
    tpu.vector_store %arg3[%c0_15, %c0_16, %c0_17], %46 {strides = array<i32>} : memref<1x8x128xf32, #tpu.memory_space<vmem>>, vector<1x8x128xf32>,
    %48 = vector.shape_cast %29 : vector<8x128xf32> to vector<1x8x128xf32>
    %c0_18 = arith.constant 0 : index
    %c0_19 = arith.constant 0 : index
    %c0_20 = arith.constant 0 : index
    %49 = vector.load %arg4[%c0_18, %c0_19, %c0_20] : memref<1x8x128xf32, #tpu.memory_space<vmem>>, vector<1x8x128xf32>
    tpu.vector_store %arg4[%c0_18, %c0_19, %c0_20], %48 {strides = array<i32>} : memref<1x8x128xf32, #tpu.memory_space<vmem>>, vector<1x8x128xf32>,
    %50 = vector.shape_cast %32 : vector<8x128xf32> to vector<1x8x128xf32>
    %c0_21 = arith.constant 0 : index
    %c0_22 = arith.constant 0 : index
    %c0_23 = arith.constant 0 : index
    %51 = vector.load %arg5[%c0_21, %c0_22, %c0_23] : memref<1x8x128xf32, #tpu.memory_space<vmem>>, vector<1x8x128xf32>
    tpu.vector_store %arg5[%c0_21, %c0_22, %c0_23], %50 {strides = array<i32>} : memref<1x8x128xf32, #tpu.memory_space<vmem>>, vector<1x8x128xf32>,
    %52 = vector.shape_cast %36 : vector<8x128xf32> to vector<1x8x128xf32>
    %c0_24 = arith.constant 0 : index
    %c0_25 = arith.constant 0 : index
    %c0_26 = arith.constant 0 : index
    %53 = vector.load %arg6[%c0_24, %c0_25, %c0_26] : memref<1x8x128xf32, #tpu.memory_space<vmem>>, vector<1x8x128xf32>
    tpu.vector_store %arg6[%c0_24, %c0_25, %c0_26], %52 {strides = array<i32>} : memref<1x8x128xf32, #tpu.memory_space<vmem>>, vector<1x8x128xf32>,
    %54 = vector.shape_cast %39 : vector<8x128xf32> to vector<1x8x128xf32>
    %c0_27 = arith.constant 0 : index
    %c0_28 = arith.constant 0 : index
    %c0_29 = arith.constant 0 : index
    %55 = vector.load %arg7[%c0_27, %c0_28, %c0_29] : memref<1x8x128xf32, #tpu.memory_space<vmem>>, vector<1x8x128xf32>
    tpu.vector_store %arg7[%c0_27, %c0_28, %c0_29], %54 {strides = array<i32>} : memref<1x8x128xf32, #tpu.memory_space<vmem>>, vector<1x8x128xf32>,
    %56 = vector.shape_cast %42 : vector<8x128xf32> to vector<1x8x128xf32>
    %c0_30 = arith.constant 0 : index
    %c0_31 = arith.constant 0 : index
    %c0_32 = arith.constant 0 : index
    %57 = vector.load %arg8[%c0_30, %c0_31, %c0_32] : memref<1x8x128xf32, #tpu.memory_space<vmem>>, vector<1x8x128xf32>
    tpu.vector_store %arg8[%c0_30, %c0_31, %c0_32], %56 {strides = array<i32>} : memref<1x8x128xf32, #tpu.memory_space<vmem>>, vector<1x8x128xf32>,
    %58 = vector.shape_cast %45 : vector<8x128xf32> to vector<1x8x128xf32>
    %c0_33 = arith.constant 0 : index
    %c0_34 = arith.constant 0 : index
    %c0_35 = arith.constant 0 : index
    %59 = vector.load %arg9[%c0_33, %c0_34, %c0_35] : memref<1x8x128xf32, #tpu.memory_space<vmem>>, vector<1x8x128xf32>
    tpu.vector_store %arg9[%c0_33, %c0_34, %c0_35], %58 {strides = array<i32>} : memref<1x8x128xf32, #tpu.memory_space<vmem>>, vector<1x8x128xf32>,
    return
  }
  func.func @transform_0(%arg0: i32) -> (i32, i32) {
    %c0_i32 = arith.constant 0 : i32
    %c0_i32_0 = arith.constant 0 : i32
    return %arg0, %c0_i32 : i32, i32
  }
  func.func @transform_1(%arg0: i32) -> (i32, i32) {
    %c0_i32 = arith.constant 0 : i32
    %c0_i32_0 = arith.constant 0 : i32
    return %arg0, %c0_i32 : i32, i32
  }
  func.func @transform_2(%arg0: i32) -> (i32, i32, i32) {
    %c0_i32 = arith.constant 0 : i32
    %c0_i32_0 = arith.constant 0 : i32
    %c0_i32_1 = arith.constant 0 : i32
    return %arg0, %c0_i32, %c0_i32_0 : i32, i32, i32
  }
  func.func @transform_3(%arg0: i32) -> (i32, i32, i32) {
    %c0_i32 = arith.constant 0 : i32
    %c0_i32_0 = arith.constant 0 : i32
    %c0_i32_1 = arith.constant 0 : i32
    return %arg0, %c0_i32, %c0_i32_0 : i32, i32, i32
  }
  func.func @transform_4(%arg0: i32) -> (i32, i32, i32) {
    %c0_i32 = arith.constant 0 : i32
    %c0_i32_0 = arith.constant 0 : i32
    %c0_i32_1 = arith.constant 0 : i32
    return %arg0, %c0_i32, %c0_i32_0 : i32, i32, i32
  }
  func.func @transform_5(%arg0: i32) -> (i32, i32, i32) {
    %c0_i32 = arith.constant 0 : i32
    %c0_i32_0 = arith.constant 0 : i32
    %c0_i32_1 = arith.constant 0 : i32
    return %arg0, %c0_i32, %c0_i32_0 : i32, i32, i32
  }
  func.func @transform_6(%arg0: i32) -> (i32, i32, i32) {
    %c0_i32 = arith.constant 0 : i32
    %c0_i32_0 = arith.constant 0 : i32
    %c0_i32_1 = arith.constant 0 : i32
    return %arg0, %c0_i32, %c0_i32_0 : i32, i32, i32
  }
  func.func @transform_7(%arg0: i32) -> (i32, i32, i32) {
    %c0_i32 = arith.constant 0 : i32
    %c0_i32_0 = arith.constant 0 : i32
    %c0_i32_1 = arith.constant 0 : i32
    return %arg0, %c0_i32, %c0_i32_0 : i32, i32, i32
  }
  func.func @transform_8(%arg0: i32) -> (i32, i32, i32) {
    %c0_i32 = arith.constant 0 : i32
    %c0_i32_0 = arith.constant 0 : i32
    %c0_i32_1 = arith.constant 0 : i32
    return %arg0, %c0_i32, %c0_i32_0 : i32, i32, i32
  }
}

</mosaic_0001>

<bundles_post_ra>
// kernel: tpu_custom_call.1
= control target key start
LH: loop header
LB: loop body
LE: loop exit
PB: predicated region body
PF: predicated region fallthrough
CT: control target
= control target key end

     0   :  { %14 = vsyncpa [#allocation3], 0  ;;  %s719_s0 = inlined_call_operand.hbm [shape: f32[16,128], index: 0, kind: input, shape index: {}]   ;;  %s720_s1 = inlined_call_operand.hbm [shape: f32[16,128], index: 1, kind: input, shape index: {}]   ;;  %s721_s2 = inlined_call_operand.hbm [shape: f32[1,8,128], index: 2, kind: output, shape index: {0}]   ;;  %s722_s3 = inlined_call_operand.hbm [shape: f32[1,8,128], index: 3, kind: output, shape index: {1}]   ;;  %s723_s4 = inlined_call_operand.hbm [shape: f32[1,8,128], index: 4, kind: output, shape index: {2}]   ;;  %s724_s5 = inlined_call_operand.hbm [shape: f32[1,8,128], index: 5, kind: output, shape index: {3}]   ;;  %s725_s6 = inlined_call_operand.hbm [shape: f32[1,8,128], index: 6, kind: output, shape index: {4}]   ;;  %s726_s7 = inlined_call_operand.hbm [shape: f32[1,8,128], index: 7, kind: output, shape index: {5}]   ;;  %s727_s8 = inlined_call_operand.hbm [shape: f32[1,8,128], index: 8, kind: output, shape index: {6}]  }
   0x1   :  { %15 = vsyncpa [#allocation6], 0 }
   0x2   :  { %16 = vsyncpa [#allocation4], 0 }
   0x3   :  { %17 = vsyncpa [#allocation9], 0 }
   0x4   :  { %18 = vsyncpa [#allocation12], 0 }
   0x5   :  { %19 = vsyncpa [#allocation15], 0 }
   0x6   :  { %24 = vsyncadd [#allocation3], 768  ;;  %s517_s27 = smov [#allocation2]   ;;  %s307_s9 = scalar_lea.hbm %s719_s0, 256 }
   0x7   :  { %s25_s28 = sshll.u32 %s517_s27, 4  ;;  %p308_p0 = scmp.ne.s32.totalorder %s719_s0, %s307_s9  ;;  %s26_s28 = int_to_ptr.vmem [resolvable:$true] %s25_s28 }
   0x8   :  { %p311_p1 = scmp.lt.u32.totalorder %s307_s9, %s719_s0 }
   0xa   :  { %p313_p2 = pnand %p311_p1, %p308_p0 }
   0xc   :  { %316 = shalt.err (!%p313_p2)
}
   0xd   :  { %s317_s14 = scalar_lea.vmem %s26_s28, 256  ;;  %s321_s15 = scalar_lea.vmem %s26_s28, 1024 }
   0xe   :  { %p318_p3 = scmp.ne.s32.totalorder %s26_s28, %s317_s14  ;;  %p322_p4 = scmp.lt.s32.totalorder %s26_s28, %s26_s28 }
   0xf   :  { %p323_p5 = scmp.lt.s32.totalorder %s321_s15, %s317_s14 }
  0x11   :  { %p324_p6 = por %p323_p5, %p322_p4 }
  0x13   :  { %p325_p7 = pnand %p324_p6, %p318_p3 }
  0x15   :  { %328 = shalt.err (!%p325_p7)
}
  0x16   :  { %s518_s16 = smov 128   ;;  %s519_s17 = smov 8  }
  0x17   :  { %31 = dma.hbm_to_vmem [thread:$0]  %s719_s0, 256, %s26_s28, [#allocation3], %s518_s16, %s518_s16, %s519_s17  }
  0x18   :  { %36 = vsyncadd [#allocation6], 768  ;;  %s520_s20 = smov [#allocation5]   ;;  %s329_s24 = scalar_lea.hbm %s720_s1, 256 }
  0x19   :  { %s37_s21 = sshll.u32 %s520_s20, 4  ;;  %p330_p8 = scmp.ne.s32.totalorder %s720_s1, %s329_s24  ;;  %s38_s21 = int_to_ptr.vmem [resolvable:$true] %s37_s21 }
  0x1a   :  { %p333_p9 = scmp.lt.u32.totalorder %s329_s24, %s720_s1 }
  0x1c   :  { %p335_p10 = pnand %p333_p9, %p330_p8 }
  0x1e   :  { %338 = shalt.err (!%p335_p10)
}
  0x1f   :  { %s339_s30 = scalar_lea.vmem %s38_s21, 256  ;;  %s343_s0 = scalar_lea.vmem %s38_s21, 1024 }
  0x20   :  { %p340_p11 = scmp.ne.s32.totalorder %s38_s21, %s339_s30  ;;  %p344_p12 = scmp.lt.s32.totalorder %s38_s21, %s38_s21 }
  0x21   :  { %p345_p13 = scmp.lt.s32.totalorder %s343_s0, %s339_s30 }
  0x23   :  { %p346_p0 = por %p345_p13, %p344_p12 }
  0x25   :  { %p347_p1 = pnand %p346_p0, %p340_p11 }
  0x27   :  { %350 = shalt.err (!%p347_p1)
}
  0x28   :  { %43 = dma.hbm_to_vmem [thread:$0]  %s720_s1, 256, %s38_s21, [#allocation6], %s518_s16, %s518_s16, %s519_s17  }
  0x29   :  { %505 = dma.done.wait [#allocation3], 1024  }
  0x2a   :  { %506 = vsyncadd [#allocation3], 4294966272 }
  0x2b   :  { %507 = dma.done.wait [#allocation6], 1024  }
  0x2c   :  { %508 = vsyncadd [#allocation6], 4294966272  ;;  %s521_s10 = smov [#allocation7]   ;;  %v61_v0 = vld [vmem:[#allocation2] sm:$0xff]  ;;  %v62_v1 = vld [vmem:[#allocation2 + $0x8] sm:$0xff]  ;;  %s522_s12 = smov [#allocation8]  }
  0x2d   :  { %s201_s11 = sshll.u32 %s521_s10, 4  ;;  %v597_v2 = vld [vmem:[#allocation5] sm:$0xff]  ;;  %v599_v3 = vld [vmem:[#allocation5 + $0x8] sm:$0xff]  ;;  %v102_v5 = vmul.f32 0.5, %v61_v0  ;;  %v103_v6 = vmul.f32 0.5, %v62_v1  ;;  %v174_v7 = vmin.f32 %v61_v0, 0.0  ;;  %v118_v10 = vadd.f32 %v62_v1, %v61_v0  ;;  %s202_s11 = int_to_ptr.vmem [resolvable:$true] %s201_s11 }
  0x2e   :  { %v126_v4 = vmul.f32 %v597_v2, %v61_v0  ;;  %s211_s13 = sshll.u32 %s522_s12, 4  ;;  %v127_v8 = vmul.f32 %v599_v3, %v62_v1  ;;  %v175_v9 = vmin.f32 %v62_v1, 0.0  ;;  %v166_v11 = vadd.f32 %v599_v3, %v597_v2  ;;  %s523_s1 = smov [#allocation14]   ;;  %s605_s13 = int_to_ptr.vmem [resolvable:$true] %s211_s13 }
  0x2f   :  { %303 = vtanh.f32 %v102_v5  ;;  %v181_v12 = vmax.f32 %v61_v0, 0.0  ;;  %v182_v13 = vmax.f32 %v62_v1, 0.0  ;;  %s251_s14 = sshll.u32 %s523_s1, 4  ;;  %s524_s15 = smov [#allocation16]   ;;  %188 = vst [vmem:[#allocation7] sm:$0xff] %v118_v10  ;;  %s619_s14 = int_to_ptr.vmem [resolvable:$true] %s251_s14 }
  0x30   :  { %s261_s16 = sshll.u32 %s524_s15, 4  ;;  %v134_v14 = vadd.f32 %v127_v8, %v126_v4  ;;  %305 = vtanh.f32 %v103_v6  ;;  %v178_v15 = vmin.f32 %v174_v7, %v175_v9  ;;  %192 = vst [vmem:[#allocation13] sm:$0xff] %v166_v11  ;;  %s351_s17 = scalar_lea.vmem %s202_s11, 128  ;;  %s621_s16 = int_to_ptr.vmem [resolvable:$true] %s261_s16 }
  0x31   :  { %v185_v16 = vmax.f32 %v181_v12, %v182_v13  ;;  %p352_p2 = scmp.ne.s32.totalorder %s202_s11, %s351_s17  ;;  %p356_p3 = scmp.lt.s32.totalorder %s202_s11, %s202_s11 }
  0x32   :  { %p357_p4 = scmp.lt.s32.totalorder %s351_s17, %s351_s17 }
  0x34   :  { %p358_p5 = por %p357_p4, %p356_p3 }
  0x36   :  { %p359_p6 = pnand %p358_p5, %p352_p2 }
  0x38   :  { %362 = shalt.err (!%p359_p6)
}
  0x39   :  { %s363_s20 = scalar_lea.hbm %s721_s2, 128 }
  0x3a   :  { %p364_p7 = scmp.ne.s32.totalorder %s721_s2, %s363_s20  ;;  %p367_p8 = scmp.lt.u32.totalorder %s363_s20, %s721_s2 }
  0x3c   :  { %p369_p9 = pnand %p367_p8, %p364_p7 }
  0x3e   :  { %372 = shalt.err (!%p369_p9)
}
  0x3f   :  { %204 = dma.vmem_to_hbm [thread:$0]  %s202_s11, 128, %s721_s2, [#allocation4]   ;;  %189 = vst [vmem:[#allocation8] sm:$0xff] %v134_v14  ;;  %v180_v17 = vmin.f32 %v178_v15, 0.0  ;;  %v187_v18 = vmax.f32 %v185_v16, 0.0 }
  0x40   :  { %s373_s27 = scalar_lea.vmem %s605_s13, 128  ;;  %p378_p11 = scmp.lt.s32.totalorder %s605_s13, %s605_s13 }
  0x41   :  { %p374_p10 = scmp.ne.s32.totalorder %s605_s13, %s373_s27  ;;  %p379_p12 = scmp.lt.s32.totalorder %s373_s27, %s373_s27 }
  0x43   :  { %p380_p13 = por %p379_p12, %p378_p11 }
  0x45   :  { %p381_p0 = pnand %p380_p13, %p374_p10 }
  0x47   :  { %384 = shalt.err (!%p381_p0)
}
  0x48   :  { %s385_s0 = scalar_lea.hbm %s722_s3, 128 }
  0x49   :  { %p386_p1 = scmp.ne.s32.totalorder %s722_s3, %s385_s0  ;;  %p389_p2 = scmp.lt.u32.totalorder %s385_s0, %s722_s3 }
  0x4b   :  { %p391_p3 = pnand %p389_p2, %p386_p1 }
  0x4d   :  { %394 = shalt.err (!%p391_p3)
}
  0x4e   :  { %214 = dma.vmem_to_hbm [thread:$0]  %s605_s13, 128, %s722_s3, [#allocation9]   ;;  %193 = vst [vmem:[#allocation14] sm:$0xff] %v180_v17  ;;  %194 = vst [vmem:[#allocation16] sm:$0xff] %v187_v18 }
  0x4f   :  { %s395_s1 = scalar_lea.vmem %s619_s14, 128  ;;  %p400_p5 = scmp.lt.s32.totalorder %s619_s14, %s619_s14 }
  0x50   :  { %p396_p4 = scmp.ne.s32.totalorder %s619_s14, %s395_s1  ;;  %p401_p6 = scmp.lt.s32.totalorder %s395_s1, %s395_s1 }
  0x52   :  { %p402_p7 = por %p401_p6, %p400_p5 }
  0x54   :  { %p403_p8 = pnand %p402_p7, %p396_p4 }
  0x56   :  { %406 = shalt.err (!%p403_p8)
}
  0x57   :  { %s407_s18 = scalar_lea.hbm %s726_s7, 128 }
  0x58   :  { %p408_p9 = scmp.ne.s32.totalorder %s726_s7, %s407_s18  ;;  %p411_p10 = scmp.lt.u32.totalorder %s407_s18, %s726_s7 }
  0x5a   :  { %p413_p11 = pnand %p411_p10, %p408_p9 }
  0x5c   :  { %416 = shalt.err (!%p413_p11)
}
  0x5d   :  { %254 = dma.vmem_to_hbm [thread:$0]  %s619_s14, 128, %s726_s7, [#allocation15]  }
  0x5e   :  { %s417_s23 = scalar_lea.vmem %s621_s16, 128  ;;  %p422_p13 = scmp.lt.s32.totalorder %s621_s16, %s621_s16 }
  0x5f   :  { %p418_p12 = scmp.ne.s32.totalorder %s621_s16, %s417_s23  ;;  %p423_p0 = scmp.lt.s32.totalorder %s417_s23, %s417_s23 }
  0x61   :  { %p424_p1 = por %p423_p0, %p422_p13 }
  0x63   :  { %p425_p2 = pnand %p424_p1, %p418_p12 }
  0x65   :  { %428 = shalt.err (!%p425_p2)
}
  0x66   :  { %s429_s26 = scalar_lea.hbm %s727_s8, 128 }
  0x67   :  { %p430_p3 = scmp.ne.s32.totalorder %s727_s8, %s429_s26  ;;  %p433_p4 = scmp.lt.u32.totalorder %s429_s26, %s727_s8 }
  0x69   :  { %p435_p5 = pnand %p433_p4, %p430_p3 }
  0x6b   :  { %438 = shalt.err (!%p435_p5)
}
  0x6c   :  { %264 = dma.vmem_to_hbm [thread:$0]  %s621_s16, 128, %s727_s8, [#allocation15]   ;;  %v304_v19 = vpop.eup %303 }
  0x6d   :  { %s525_s2 = smov [#allocation10]   ;;  %v306_v20 = vpop.eup %305  ;;  %v150_v21 = vmul.f32 %v304_v19, %v597_v2  ;;  %s526_s9 = smov [#allocation11]  }
  0x6e   :  { %s221_s28 = sshll.u32 %s525_s2, 4  ;;  %s231_s10 = sshll.u32 %s526_s9, 4  ;;  %v151_v22 = vmul.f32 %v306_v20, %v599_v3  ;;  %v142_v23 = vadd.f32 %v306_v20, %v304_v19  ;;  %s222_s28 = int_to_ptr.vmem [resolvable:$true] %s221_s28  ;;  %s232_s10 = int_to_ptr.vmem [resolvable:$true] %s231_s10 }
  0x6f   :  { %s527_s11 = smov [#allocation13]   ;;  %s439_s8 = scalar_lea.vmem %s222_s28, 128 }
  0x70   :  { %s241_s12 = sshll.u32 %s527_s11, 4  ;;  %v158_v24 = vadd.f32 %v151_v22, %v150_v21  ;;  %190 = vst [vmem:[#allocation10] sm:$0xff] %v142_v23  ;;  %p440_p6 = scmp.ne.s32.totalorder %s222_s28, %s439_s8  ;;  %s676_s12 = int_to_ptr.vmem [resolvable:$true] %s241_s12 }
  0x71   :  { %p444_p7 = scmp.lt.s32.totalorder %s222_s28, %s222_s28  ;;  %p445_p8 = scmp.lt.s32.totalorder %s439_s8, %s439_s8 }
  0x73   :  { %p446_p9 = por %p445_p8, %p444_p7 }
  0x75   :  { %p447_p10 = pnand %p446_p9, %p440_p6 }
  0x77   :  { %450 = shalt.err (!%p447_p10)
}
  0x78   :  { %s451_s15 = scalar_lea.hbm %s723_s4, 128 }
  0x79   :  { %p452_p11 = scmp.ne.s32.totalorder %s723_s4, %s451_s15  ;;  %p455_p12 = scmp.lt.u32.totalorder %s451_s15, %s723_s4 }
  0x7b   :  { %p457_p13 = pnand %p455_p12, %p452_p11 }
  0x7d   :  { %460 = shalt.err (!%p457_p13)
}
  0x7e   :  { %224 = dma.vmem_to_hbm [thread:$0]  %s222_s28, 128, %s723_s4, [#allocation9]   ;;  %191 = vst [vmem:[#allocation11] sm:$0xff] %v158_v24 }
  0x7f   :  { %s461_s13 = scalar_lea.vmem %s232_s10, 128  ;;  %p466_p1 = scmp.lt.s32.totalorder %s232_s10, %s232_s10 }
  0x80   :  { %p462_p0 = scmp.ne.s32.totalorder %s232_s10, %s461_s13  ;;  %p467_p2 = scmp.lt.s32.totalorder %s461_s13, %s461_s13 }
  0x82   :  { %p468_p3 = por %p467_p2, %p466_p1 }
  0x84   :  { %p469_p4 = pnand %p468_p3, %p462_p0 }
  0x86   :  { %472 = shalt.err (!%p469_p4)
}
  0x87   :  { %s473_s24 = scalar_lea.hbm %s724_s5, 128 }
  0x88   :  { %p474_p5 = scmp.ne.s32.totalorder %s724_s5, %s473_s24  ;;  %p477_p6 = scmp.lt.u32.totalorder %s473_s24, %s724_s5 }
  0x8a   :  { %p479_p7 = pnand %p477_p6, %p474_p5 }
  0x8c   :  { %482 = shalt.err (!%p479_p7)
}
  0x8d   :  { %234 = dma.vmem_to_hbm [thread:$0]  %s232_s10, 128, %s724_s5, [#allocation12]  }
  0x8e   :  { %s483_s0 = scalar_lea.vmem %s676_s12, 128  ;;  %p488_p9 = scmp.lt.s32.totalorder %s676_s12, %s676_s12 }
  0x8f   :  { %p484_p8 = scmp.ne.s32.totalorder %s676_s12, %s483_s0  ;;  %p489_p10 = scmp.lt.s32.totalorder %s483_s0, %s483_s0 }
  0x91   :  { %p490_p11 = por %p489_p10, %p488_p9 }
  0x93   :  { %p491_p12 = pnand %p490_p11, %p484_p8 }
  0x95   :  { %494 = shalt.err (!%p491_p12)
}
  0x96   :  { %s495_s2 = scalar_lea.hbm %s725_s6, 128 }
  0x97   :  { %p496_p13 = scmp.ne.s32.totalorder %s725_s6, %s495_s2  ;;  %p499_p0 = scmp.lt.u32.totalorder %s495_s2, %s725_s6 }
  0x99   :  { %p501_p1 = pnand %p499_p0, %p496_p13 }
  0x9b   :  { %504 = shalt.err (!%p501_p1)
}
  0x9c   :  { %244 = dma.vmem_to_hbm [thread:$0]  %s676_s12, 128, %s725_s6, [#allocation12]  }
  0x9d   :  { %509 = dma.done.wait [#allocation4], 128  }
  0x9e   :  { %510 = vsyncadd [#allocation4], 4294967168 }
  0x9f   :  { %511 = dma.done.wait [#allocation9], 256  }
  0xa0   :  { %512 = vsyncadd [#allocation9], 4294967040 }
  0xa1   :  { %513 = dma.done.wait [#allocation12], 256  }
  0xa2   :  { %514 = vsyncadd [#allocation12], 4294967040 }
  0xa3   :  { %515 = dma.done.wait [#allocation15], 256  }
  0xa4   :  { %516 = vsyncadd [#allocation15], 4294967040 }
  0xa5   :  { %286 = vsyncpa [#allocation3], 1 }
  0xa6   :  { %287 = vsyncpa [#allocation6], 1 }
  0xa7   :  { %288 = vsyncpa [#allocation4], 1 }
  0xa8   :  { %289 = vsyncpa [#allocation9], 1 }
  0xa9   :  { %290 = vsyncpa [#allocation12], 1 }
  0xaa   :  { %291 = vsyncpa [#allocation15], 1 }

</bundles_post_ra>
